<compile_context>
chip_gen: v7x
topology: tpu7x:2x2x1
jax: 0.10.0
libtpu: 0.0.40
codegen_flags: <defaults>
</compile_context>

<pallas_src>
import functools

import jax
import jax.numpy as jnp
from jax.experimental import pallas as pl
from jax.experimental.pallas import tpu as pltpu

_LANES = 128
_MAX_BLOCK_ROWS = 2048            # 2048*128*4B = 1 MiB per input per buffer
_MIN_PALLAS_ELEMS = 8 * _LANES    # below one (8,128) tile, plain XLA is cheaper


# ----------------------------------------------------------------------------
# Pallas kernels: per-block (8,128) partial sums (the hot path of the loss).
# ----------------------------------------------------------------------------
def _partial_sumsq_diff_kernel(a_ref, b_ref, o_ref, *, total_rows, block_rows):
    """o[i] = (8,128) partial sum of (a-b)^2 for grid block i."""
    i = pl.program_id(0)
    a = a_ref[...].astype(jnp.float32)
    b = b_ref[...].astype(jnp.float32)
    d = a - b
    sq = d * d
    if total_rows % block_rows != 0:  # static: mask only when a ragged block exists
        row = jax.lax.broadcasted_iota(jnp.int32, sq.shape, 0) + i * block_rows
        sq = jnp.where(row < total_rows, sq, 0.0)
    # Reduce (block_rows,128) -> (8,128): elementwise adds across vregs (VPU),
    # free filler under the DMA-bound loop.  No cross-lane reduce in-kernel.
    o_ref[0] = jnp.sum(sq.reshape(block_rows // 8, 8, _LANES), axis=0)


def _partial_sumsq_kernel(a_ref, o_ref, *, total_rows, block_rows):
    """o[i] = (8,128) partial sum of a^2 for grid block i."""
    i = pl.program_id(0)
    v = a_ref[...].astype(jnp.float32)
    sq = v * v
    if total_rows % block_rows != 0:
        row = jax.lax.broadcasted_iota(jnp.int32, sq.shape, 0) + i * block_rows
        sq = jnp.where(row < total_rows, sq, 0.0)
    o_ref[0] = jnp.sum(sq.reshape(block_rows // 8, 8, _LANES), axis=0)


# ----------------------------------------------------------------------------
# Wrappers.
# ----------------------------------------------------------------------------
def _pallas_blockwise_sum(kernel_fn, arrays):
    """Sum-reduction over large lane-divisible arrays via one pallas_call."""
    n = arrays[0].size
    rows = n // _LANES
    # Free reshape of the native-dtype buffer -- no pad, no copy, no upcast.
    views = [jnp.ravel(x).reshape(rows, _LANES) for x in arrays]
    block_rows = min(_MAX_BLOCK_ROWS, (rows // 8) * 8)
    n_blocks = pl.cdiv(rows, block_rows)
    kernel = functools.partial(kernel_fn, total_rows=rows, block_rows=block_rows)
    partials = pl.pallas_call(
        kernel,
        out_shape=jax.ShapeDtypeStruct((n_blocks, 8, _LANES), jnp.float32),
        grid=(n_blocks,),
        in_specs=[pl.BlockSpec((block_rows, _LANES), lambda i: (i, 0))
                  for _ in views],
        out_specs=pl.BlockSpec((1, 8, _LANES), lambda i: (i, 0, 0)),
        compiler_params=pltpu.CompilerParams(
            dimension_semantics=("parallel",)),   # independent blocks -> megacore OK
    )(*views)
    # Final tiny reduce (n_blocks*8*128 floats) in XLA.
    return jnp.sum(partials)


def pallas_sumsq_diff(a, b):
    """sum((a-b)^2) over all elements, f32 accumulation."""
    n = a.size
    if n < _MIN_PALLAS_ELEMS or n % _LANES != 0:
        # Tiny or lane-ragged tensors: plain XLA beats any Pallas launch.
        d = jnp.ravel(a).astype(jnp.float32) - jnp.ravel(b).astype(jnp.float32)
        return jnp.sum(d * d)
    return _pallas_blockwise_sum(_partial_sumsq_diff_kernel, [a, b])


def pallas_sumsq(a):
    """sum(a^2) over all elements, f32 accumulation."""
    n = a.size
    if n < _MIN_PALLAS_ELEMS or n % _LANES != 0:
        v = jnp.ravel(a).astype(jnp.float32)
        return jnp.sum(v * v)
    return _pallas_blockwise_sum(_partial_sumsq_kernel, [a])


# ----------------------------------------------------------------------------
# Constrained_Loss forward in JAX / Pallas.
# ----------------------------------------------------------------------------
def mse_objective(y_pred, y_gt):
    return pallas_sumsq_diff(y_pred, y_gt) / jnp.float32(y_pred.size)


def constrained_loss_forward(y_pred, y_gt, model_params, constraint_weights=None):
    """Mirrors Constrained_Loss.forward."""
    data_fidelity = mse_objective(y_pred, y_gt)
    if constraint_weights is None:
        return data_fidelity

    # All constraints here are weighted L2 penalties on the same parameter set,
    # so sum_c w_c * S == (sum_c w_c) * S: compute S = sum_p ||p||^2 exactly once.
    total_weight = jnp.float32(0.0)
    for w in constraint_weights.values():
        total_weight = total_weight + jnp.float32(w)

    sumsq_params = jnp.float32(0.0)
    for p in model_params.values():
        sumsq_params = sumsq_params + pallas_sumsq(p)

    constraint_norm = total_weight * sumsq_params
    # PyTorch: if constraint_norm > 100.0 -> log(constraint_norm)
    # TODO(synk): the original is data-dependent Python control flow; expressed
    # here as a jnp.where on the scalar (identical forward value).
    constraint_norm = jnp.where(constraint_norm > 100.0,
                                jnp.log(constraint_norm),
                                constraint_norm)
    return data_fidelity + constraint_norm


if __name__ == "__main__":
    key = jax.random.PRNGKey(0)
    k1, k2, k3, k4, k5, k6 = jax.random.split(key, 6)

    # Small NCHW predictions / targets.
    y_pred = jax.random.normal(k1, (2, 4, 16, 16), dtype=jnp.float32)
    y_gt = jax.random.normal(k2, (2, 4, 16, 16), dtype=jnp.float32)

    # Deterministic synthetic "model parameters" (shapes of a tiny net).
    # fc.weight (64,32) exercises the Pallas sumsq path; head.weight (18,64)
    # exercises the ragged-last-block masking path; the others hit the tiny-
    # tensor XLA fallback.
    model_params = {
        "conv.weight": 0.1 * jax.random.normal(k3, (4, 4, 3, 3), jnp.float32),
        "conv.bias": 0.1 * jax.random.normal(k4, (4,), jnp.float32),
        "fc.weight": 0.1 * jax.random.normal(k5, (64, 32), jnp.float32),
        "head.weight": 0.1 * jax.random.normal(k6, (18, 64), jnp.float32),
    }

    # Two constraints with different penalty weights.
    constraint_weights = {"l2_a": 0.5, "l2_b": 0.25}

    loss = constrained_loss_forward(y_pred, y_gt, model_params,
                                    constraint_weights)
    loss = jax.block_until_ready(loss)

    # Pure-JAX reference check (glue-level sanity, same math).
    ref_df = jnp.mean((y_pred - y_gt) ** 2)
    ref_s = sum(jnp.sum(p.astype(jnp.float32) ** 2)
                for p in model_params.values())
    ref_cn = sum(constraint_weights.values()) * ref_s
    ref_cn = jnp.where(ref_cn > 100.0, jnp.log(ref_cn), ref_cn)
    ref = ref_df + ref_cn
    assert jnp.allclose(loss, ref, rtol=1e-5, atol=1e-5), (loss, ref)

    print("KERNEL_OK")
</pallas_src>

<mosaic_0001>
module attributes {stable_mosaic.version = 11 : i64} {
  func.func @_partial_sumsq_diff_kernel(%arg0: i32, %arg1: memref<16x128xf32, #tpu.memory_space<vmem>>, %arg2: memref<16x128xf32, #tpu.memory_space<vmem>>, %arg3: memref<1x8x128xf32, #tpu.memory_space<vmem>>) attributes {dimension_semantics = [#tpu.dimension_semantics<parallel>], iteration_bounds = array<i64: 1>, scalar_prefetch = 0 : i64, scratch_operands = 0 : i64, tpu.core_type = #tpu.core_type<tc>, window_params = [{transform_indices = @transform_0, window_bounds = array<i64: 16, 128>}, {transform_indices = @transform_1, window_bounds = array<i64: 16, 128>}, {transform_indices = @transform_2, window_bounds = array<i64: 1, 8, 128>}]} {
    %c0 = arith.constant 0 : index
    %c0_0 = arith.constant 0 : index
    %0 = vector.load %arg1[%c0, %c0_0] : memref<16x128xf32, #tpu.memory_space<vmem>>, vector<16x128xf32>
    %c0_1 = arith.constant 0 : index
    %c0_2 = arith.constant 0 : index
    %1 = vector.load %arg2[%c0_1, %c0_2] : memref<16x128xf32, #tpu.memory_space<vmem>>, vector<16x128xf32>
    %2 = arith.subf %0, %1 : vector<16x128xf32>
    %3 = arith.mulf %2, %2 : vector<16x128xf32>
    %4 = vector.shape_cast %3 : vector<16x128xf32> to vector<2x8x128xf32>
    %cst = arith.constant dense<0.000000e+00> : vector<8x128xf32>
    %5 = vector.multi_reduction <add>, %4, %cst [0] : vector<2x8x128xf32> to vector<8x128xf32>
    %c0_3 = arith.constant 0 : index
    %c0_4 = arith.constant 0 : index
    %c0_5 = arith.constant 0 : index
    %6 = vector.load %arg3[%c0_3, %c0_4, %c0_5] : memref<1x8x128xf32, #tpu.memory_space<vmem>>, vector<1x8x128xf32>
    %7 = vector.shape_cast %6 : vector<1x8x128xf32> to vector<8x128xf32>
    %8 = vector.shape_cast %5 : vector<8x128xf32> to vector<1x8x128xf32>
    tpu.vector_store %arg3[%c0_3, %c0_4, %c0_5], %8 {strides = array<i32>} : memref<1x8x128xf32, #tpu.memory_space<vmem>>, vector<1x8x128xf32>,
    return
  }
  func.func @transform_0(%arg0: i32) -> (i32, i32) {
    %c0_i32 = arith.constant 0 : i32
    %c0_i32_0 = arith.constant 0 : i32
    return %arg0, %c0_i32 : i32, i32
  }
  func.func @transform_1(%arg0: i32) -> (i32, i32) {
    %c0_i32 = arith.constant 0 : i32
    %c0_i32_0 = arith.constant 0 : i32
    return %arg0, %c0_i32 : i32, i32
  }
  func.func @transform_2(%arg0: i32) -> (i32, i32, i32) {
    %c0_i32 = arith.constant 0 : i32
    %c0_i32_0 = arith.constant 0 : i32
    %c0_i32_1 = arith.constant 0 : i32
    return %arg0, %c0_i32, %c0_i32_0 : i32, i32, i32
  }
}

</mosaic_0001>

<bundles_post_ra>
// kernel: tpu_custom_call.1
= control target key start
LH: loop header
LB: loop body
LE: loop exit
PB: predicated region body
PF: predicated region fallthrough
CT: control target
= control target key end

     0   :  { %7 = vsyncpa [#allocation3], 0  ;;  %s199_s0 = inlined_call_operand.hbm [shape: f32[16,128], index: 0, kind: input, shape index: {}]   ;;  %s200_s1 = inlined_call_operand.hbm [shape: f32[16,128], index: 1, kind: input, shape index: {}]   ;;  %s201_s2 = inlined_call_operand.hbm [shape: f32[1,8,128], index: 2, kind: output, shape index: {}]  }
   0x1   :  { %8 = vsyncpa [#allocation6], 0 }
   0x2   :  { %9 = vsyncpa [#allocation4], 0  ;;  %s143_s9 = smov [#allocation2]   ;;  %s71_s13 = scalar_lea.hbm %s199_s0, 256 }
   0x3   :  { %s15_s10 = sshll.u32 %s143_s9, 4  ;;  %p72_p0 = scmp.ne.s32.totalorder %s199_s0, %s71_s13  ;;  %s16_s10 = int_to_ptr.vmem [resolvable:$true] %s15_s10 }
   0x4   :  { %p75_p1 = scmp.lt.u32.totalorder %s71_s13, %s199_s0 }
   0x6   :  { %p77_p2 = pnand %p75_p1, %p72_p0 }
   0x8   :  { %80 = shalt.err (!%p77_p2)
}
   0x9   :  { %s81_s18 = scalar_lea.vmem %s16_s10, 256  ;;  %p86_p4 = scmp.lt.s32.totalorder %s16_s10, %s16_s10 }
   0xa   :  { %p82_p3 = scmp.ne.s32.totalorder %s16_s10, %s81_s18  ;;  %p87_p5 = scmp.lt.s32.totalorder %s81_s18, %s81_s18 }
   0xc   :  { %p88_p6 = por %p87_p5, %p86_p4 }
   0xe   :  { %p89_p7 = pnand %p88_p6, %p82_p3 }
  0x10   :  { %92 = shalt.err (!%p89_p7)
}
  0x11   :  { %s144_s19 = smov 128   ;;  %s145_s20 = smov 8  }
  0x12   :  { %21 = dma.hbm_to_vmem [thread:$0]  %s199_s0, 256, %s16_s10, [#allocation3], %s144_s19, %s144_s19, %s145_s20  }
  0x13   :  { %s146_s23 = smov [#allocation5]   ;;  %s93_s27 = scalar_lea.hbm %s200_s1, 256 }
  0x14   :  { %s27_s24 = sshll.u32 %s146_s23, 4  ;;  %p94_p8 = scmp.ne.s32.totalorder %s200_s1, %s93_s27  ;;  %s28_s24 = int_to_ptr.vmem [resolvable:$true] %s27_s24 }
  0x15   :  { %p97_p9 = scmp.lt.u32.totalorder %s93_s27, %s200_s1 }
  0x17   :  { %p99_p10 = pnand %p97_p9, %p94_p8 }
  0x19   :  { %102 = shalt.err (!%p99_p10)
}
  0x1a   :  { %s103_s4 = scalar_lea.vmem %s28_s24, 256  ;;  %p108_p12 = scmp.lt.s32.totalorder %s28_s24, %s28_s24 }
  0x1b   :  { %p104_p11 = scmp.ne.s32.totalorder %s28_s24, %s103_s4  ;;  %p109_p13 = scmp.lt.s32.totalorder %s103_s4, %s103_s4 }
  0x1d   :  { %p110_p0 = por %p109_p13, %p108_p12 }
  0x1f   :  { %p111_p1 = pnand %p110_p0, %p104_p11 }
  0x21   :  { %114 = shalt.err (!%p111_p1)
}
  0x22   :  { %33 = dma.hbm_to_vmem [thread:$0]  %s200_s1, 256, %s28_s24, [#allocation6], %s144_s19, %s144_s19, %s145_s20  }
  0x23   :  { %137 = dma.done.wait [#allocation3], 256  }
  0x24   :  { %138 = vsyncadd [#allocation3], 4294967040 }
  0x25   :  { %139 = dma.done.wait [#allocation6], 256  }
  0x26   :  { %140 = vsyncadd [#allocation6], 4294967040  ;;  %v40_v0 = vld [vmem:[#allocation2] sm:$0xff]  ;;  %v41_v1 = vld [vmem:[#allocation2 + $0x8] sm:$0xff]  ;;  %s147_s6 = smov [#allocation7]  }
  0x27   :  { %v42_v2 = vld [vmem:[#allocation5] sm:$0xff]  ;;  %v43_v3 = vld [vmem:[#allocation5 + $0x8] sm:$0xff]  ;;  %s56_s7 = sshll.u32 %s147_s6, 4  ;;  %s57_s7 = int_to_ptr.vmem [resolvable:$true] %s56_s7 }
  0x28   :  { %v44_v4 = vsub.f32 %v40_v0, %v42_v2  ;;  %v45_v5 = vsub.f32 %v41_v1, %v43_v3  ;;  %s115_s8 = scalar_lea.vmem %s57_s7, 128  ;;  %p120_p3 = scmp.lt.s32.totalorder %s57_s7, %s57_s7 }
  0x29   :  { %p116_p2 = scmp.ne.s32.totalorder %s57_s7, %s115_s8  ;;  %p121_p4 = scmp.lt.s32.totalorder %s115_s8, %s115_s8 }
  0x2a   :  { %v46_v6 = vmul.f32 %v44_v4, %v44_v4  ;;  %v47_v7 = vmul.f32 %v45_v5, %v45_v5 }
  0x2b   :  { %p122_p5 = por %p121_p4, %p120_p3 }
  0x2c   :  { %v48_v8 = vadd.f32 %v47_v7, %v46_v6 }
  0x2d   :  { %p123_p6 = pnand %p122_p5, %p116_p2 }
  0x2e   :  { %49 = vst [vmem:[#allocation7] sm:$0xff] %v48_v8 }
  0x2f   :  { %126 = shalt.err (!%p123_p6)
}
  0x30   :  { %s127_s10 = scalar_lea.hbm %s201_s2, 128 }
  0x31   :  { %p128_p7 = scmp.ne.s32.totalorder %s201_s2, %s127_s10  ;;  %p131_p8 = scmp.lt.u32.totalorder %s127_s10, %s201_s2 }
  0x33   :  { %p133_p9 = pnand %p131_p8, %p128_p7 }
  0x35   :  { %136 = shalt.err (!%p133_p9)
}
  0x36   :  { %59 = dma.vmem_to_hbm [thread:$0]  %s57_s7, 128, %s201_s2, [#allocation4]  }
  0x37   :  { %141 = dma.done.wait [#allocation4], 128  }
  0x38   :  { %142 = vsyncadd [#allocation4], 4294967168 }
  0x39   :  { %63 = vsyncpa [#allocation3], 1 }
  0x3a   :  { %64 = vsyncpa [#allocation6], 1 }
  0x3b   :  { %65 = vsyncpa [#allocation4], 1 }

</bundles_post_ra>
